<compile_context>
chip_gen: v7x
topology: tpu7x:2x2x1
jax: 0.10.0
libtpu: 0.0.40
codegen_flags: <defaults>
</compile_context>

<pallas_src>
import jax
import jax.numpy as jnp
from jax.experimental import pallas as pl
from jax.experimental.pallas import tpu as pltpu


def _round_up(x: int, m: int) -> int:
    return ((x + m - 1) // m) * m


def _vmem_config():
    """Returns (f32 logits-tile budget bytes, vmem_limit_bytes), chip gated."""
    cap = None
    try:
        cap = pltpu.get_tpu_info().vmem_capacity_bytes
    except Exception:
        cap = None
    if cap is not None and cap >= 128 * 1024 * 1024:
        # v5e / v6e: 128 MiB physical VMEM per core -> larger tiles are safe.
        return 8 * 1024 * 1024, 96 * 1024 * 1024
    # v7x (64 MiB per TC) or unknown chip: stay conservative.
    return 4 * 1024 * 1024, 48 * 1024 * 1024


def _choose_tiles(batch, num_classes, budget_bytes, block_b=None, block_k=None):
    """Pick (TB, TK): TB multiple of 8; TK == K (full) or a multiple of 128."""
    b8 = _round_up(max(batch, 1), 8)
    elems = max(budget_bytes // 4, 8 * 128)          # f32 elements per logits tile

    if block_k is not None:
        tk = block_k
    elif num_classes * 128 <= elems or num_classes <= 2048:
        tk = num_classes                             # full class axis, one step
    else:
        tk = min(_round_up(num_classes, 128),
                 max(512, (elems // 256) // 128 * 128))

    if block_b is not None:
        tb = _round_up(block_b, 8)
    else:
        rows = max(8, (elems // max(tk, 1)) // 8 * 8)
        tb = min(b8, rows, 4096)
        # Guarantee >= 2 batch steps so the "parallel" axis can shard across
        # v7x's two TensorCores (one extra ~0.35us step on v5e/v6e: negligible).
        if tb >= b8 and b8 >= 16:
            tb = _round_up((b8 + 1) // 2, 8)
    return tb, tk


def _make_kernel(epsilon: float, num_classes: int, needs_col_mask: bool):
    one_minus_eps = 1.0 - float(epsilon)
    eps_over_k = float(epsilon) / float(num_classes)

    def kernel(x_ref, tgt_ref, loss_ref, m_sc, l_sc, sumx_sc, tgtx_sc):
        kstep = pl.program_id(1)

        @pl.when(kstep == 0)
        def _():
            m_sc[...] = jnp.full_like(m_sc, -jnp.inf)
            l_sc[...] = jnp.zeros_like(l_sc)
            sumx_sc[...] = jnp.zeros_like(sumx_sc)
            tgtx_sc[...] = jnp.zeros_like(tgtx_sc)

        x_raw = x_ref[...]                         # (TB, TK) logits, native dtype
        tb, tk = x_raw.shape
        labels = tgt_ref[...]                      # (TB, 1) int32 class ids

        col_ids = kstep * tk + jax.lax.broadcasted_iota(jnp.int32, (tb, tk), 1)

        # Row max in the input dtype (exact for bf16); only (TB,1) is cast.
        if needs_col_mask:
            valid = col_ids < num_classes
            x_for_max = jnp.where(valid, x_raw, jnp.asarray(-jnp.inf, x_raw.dtype))
        else:
            x_for_max = x_raw
        tile_max = jnp.max(x_for_max, axis=1, keepdims=True).astype(jnp.float32)
        m_new = jnp.maximum(m_sc[...], tile_max)

        # Online LSE accumulation in f32; (x - m) only lives inside the exp.
        x = x_raw.astype(jnp.float32)
        p = jnp.exp(x - m_new)
        if needs_col_mask:
            p = jnp.where(valid, p, 0.0)
        l_sc[...] = (l_sc[...] * jnp.exp(m_sc[...] - m_new)
                     + jnp.sum(p, axis=1, keepdims=True))
        m_sc[...] = m_new

        # Running raw sum of logits (f32).
        x_sum_src = jnp.where(valid, x, 0.0) if needs_col_mask else x
        sumx_sc[...] = sumx_sc[...] + jnp.sum(x_sum_src, axis=1, keepdims=True)

        # Raw logit at the target class: single nonzero per row, so the masked
        # sum is exact even in bf16.  (col == label implies col < num_classes.)
        tgt_hit = jnp.where(col_ids == labels, x_raw, jnp.zeros_like(x_raw))
        tgtx_sc[...] = tgtx_sc[...] + jnp.sum(
            tgt_hit, axis=1, keepdims=True).astype(jnp.float32)

        @pl.when(kstep == pl.num_programs(1) - 1)
        def _():
            lse = m_sc[...] + jnp.log(l_sc[...])
            loss_ref[...] = (lse
                             - one_minus_eps * tgtx_sc[...]
                             - eps_over_k * sumx_sc[...])

    return kernel


def cross_entropy_label_smooth(inputs, targets, num_classes, epsilon=0.1,
                               reduction=True, block_b=None, block_k=None):
    """inputs: (B, num_classes) float logits (f32 or bf16); targets: (B,) int labels.

    Returns scalar mean loss (reduction=True) or per-sample losses (reduction=False),
    matching the PyTorch CrossEntropyLabelSmooth forward.
    """
    b, k = inputs.shape
    assert k == num_classes

    budget_bytes, vmem_limit = _vmem_config()
    tb, tk = _choose_tiles(b, num_classes, budget_bytes, block_b, block_k)
    assert tk == num_classes or tk % 128 == 0
    grid_b = pl.cdiv(b, tb)
    grid_k = pl.cdiv(num_classes, tk)
    needs_col_mask = (num_classes % tk) != 0

    tgt2d = targets.astype(jnp.int32).reshape(b, 1)

    itemsize = jnp.dtype(inputs.dtype).itemsize
    cost = pl.CostEstimate(
        flops=6 * b * num_classes,
        transcendentals=b * num_classes,
        bytes_accessed=b * num_classes * itemsize + b * 8,
    )

    per_sample = pl.pallas_call(
        _make_kernel(epsilon, num_classes, needs_col_mask),
        out_shape=jax.ShapeDtypeStruct((b, 1), jnp.float32),
        grid_spec=pltpu.PrefetchScalarGridSpec(
            num_scalar_prefetch=0,
            grid=(grid_b, grid_k),
            in_specs=[
                pl.BlockSpec((tb, tk), lambda i, j: (i, j)),
                pl.BlockSpec((tb, 1), lambda i, j: (i, 0)),
            ],
            out_specs=pl.BlockSpec((tb, 1), lambda i, j: (i, 0)),
            scratch_shapes=[pltpu.VMEM((tb, 1), jnp.float32)] * 4,
        ),
        compiler_params=pltpu.CompilerParams(
            dimension_semantics=("parallel", "arbitrary"),
            vmem_limit_bytes=vmem_limit,
        ),
        cost_estimate=cost,
    )(inputs, tgt2d)

    per_sample = per_sample[:, 0]
    if reduction:
        return jnp.mean(per_sample)
    return per_sample


if __name__ == "__main__":
    batch = 12            # deliberately NOT a multiple of 8: ragged last batch tile
    num_classes = 384
    epsilon = 0.1

    key = jax.random.PRNGKey(0)
    k_logits, k_labels = jax.random.split(key)
    logits = jax.random.normal(k_logits, (batch, num_classes), dtype=jnp.float32)
    labels = jax.random.randint(k_labels, (batch,), 0, num_classes, dtype=jnp.int32)

    # Pure-JAX reference (same math as the PyTorch module).
    log_probs = jax.nn.log_softmax(logits, axis=1)
    one_hot = jax.nn.one_hot(labels, num_classes, dtype=jnp.float32)
    smoothed = (1.0 - epsilon) * one_hot + epsilon / num_classes
    ref_per = jnp.sum(-smoothed * log_probs, axis=1)
    ref_mean = jnp.mean(ref_per)

    # 1) Default tiling: full-K class step, >=2 "parallel" batch steps, no pad.
    loss = jax.block_until_ready(
        cross_entropy_label_smooth(logits, labels, num_classes, epsilon))
    assert jnp.allclose(loss, ref_mean, atol=1e-5, rtol=1e-5), (loss, ref_mean)

    # 2) Forced class-tiled online-LSE path (K divisible by the class tile).
    loss2 = jax.block_until_ready(
        cross_entropy_label_smooth(logits, labels, num_classes, epsilon,
                                   block_b=8, block_k=128))
    assert jnp.allclose(loss2, ref_mean, atol=1e-5, rtol=1e-5), (loss2, ref_mean)

    # 3) Class-tiled path with a ragged class tile (exercises column masking)
    #    and per-sample (reduction=False) output.
    per3 = jax.block_until_ready(
        cross_entropy_label_smooth(logits, labels, num_classes, epsilon,
                                   reduction=False, block_b=8, block_k=256))
    assert jnp.allclose(per3, ref_per, atol=1e-5, rtol=1e-5), (per3, ref_per)

    print("KERNEL_OK")
</pallas_src>

<mosaic_0001>
module attributes {stable_mosaic.version = 11 : i64} {
  func.func @kernel(%arg0: i32, %arg1: i32, %arg2: memref<8x384xf32, #tpu.memory_space<vmem>>, %arg3: memref<8x1xi32, #tpu.memory_space<vmem>>, %arg4: memref<8x1xf32, #tpu.memory_space<vmem>>, %arg5: memref<8x1xf32, #tpu.memory_space<vmem>>, %arg6: memref<8x1xf32, #tpu.memory_space<vmem>>, %arg7: memref<8x1xf32, #tpu.memory_space<vmem>>, %arg8: memref<8x1xf32, #tpu.memory_space<vmem>>) attributes {dimension_semantics = [#tpu.dimension_semantics<parallel>, #tpu.dimension_semantics<arbitrary>], iteration_bounds = array<i64: 2, 1>, scalar_prefetch = 0 : i64, scratch_operands = 4 : i64, tpu.core_type = #tpu.core_type<tc>, window_params = [{transform_indices = @transform_0, window_bounds = array<i64: 8, 384>}, {transform_indices = @transform_1, window_bounds = array<i64: 8, 1>}, {transform_indices = @transform_2, window_bounds = array<i64: 8, 1>}]} {
    %c0_i32 = arith.constant 0 : i32
    %0 = arith.cmpi eq, %arg1, %c0_i32 : i32
    %1 = arith.extui %0 : i1 to i32
    %c0_i32_0 = arith.constant 0 : i32
    %2 = arith.cmpi ne, %1, %c0_i32_0 : i32
    scf.if %2 {
      %cst_28 = arith.constant 0xFF800000 : f32
      %43 = vector.broadcast %cst_28 : f32 to vector<8x1xf32>
      %c0_29 = arith.constant 0 : index
      %c0_30 = arith.constant 0 : index
      %44 = vector.load %arg5[%c0_29, %c0_30] : memref<8x1xf32, #tpu.memory_space<vmem>>, vector<8x1xf32>
      tpu.vector_store %arg5[%c0_29, %c0_30], %43 {strides = array<i32>} : memref<8x1xf32, #tpu.memory_space<vmem>>, vector<8x1xf32>,
      %cst_31 = arith.constant 0.000000e+00 : f32
      %45 = vector.broadcast %cst_31 : f32 to vector<8x1xf32>
      %c0_32 = arith.constant 0 : index
      %c0_33 = arith.constant 0 : index
      %46 = vector.load %arg6[%c0_32, %c0_33] : memref<8x1xf32, #tpu.memory_space<vmem>>, vector<8x1xf32>
      tpu.vector_store %arg6[%c0_32, %c0_33], %45 {strides = array<i32>} : memref<8x1xf32, #tpu.memory_space<vmem>>, vector<8x1xf32>,
      %cst_34 = arith.constant 0.000000e+00 : f32
      %47 = vector.broadcast %cst_34 : f32 to vector<8x1xf32>
      %c0_35 = arith.constant 0 : index
      %c0_36 = arith.constant 0 : index
      %48 = vector.load %arg7[%c0_35, %c0_36] : memref<8x1xf32, #tpu.memory_space<vmem>>, vector<8x1xf32>
      tpu.vector_store %arg7[%c0_35, %c0_36], %47 {strides = array<i32>} : memref<8x1xf32, #tpu.memory_space<vmem>>, vector<8x1xf32>,
      %cst_37 = arith.constant 0.000000e+00 : f32
      %49 = vector.broadcast %cst_37 : f32 to vector<8x1xf32>
      %c0_38 = arith.constant 0 : index
      %c0_39 = arith.constant 0 : index
      %50 = vector.load %arg8[%c0_38, %c0_39] : memref<8x1xf32, #tpu.memory_space<vmem>>, vector<8x1xf32>
      tpu.vector_store %arg8[%c0_38, %c0_39], %49 {strides = array<i32>} : memref<8x1xf32, #tpu.memory_space<vmem>>, vector<8x1xf32>,
    } else {
    }
    %c0 = arith.constant 0 : index
    %c0_1 = arith.constant 0 : index
    %3 = vector.load %arg2[%c0, %c0_1] : memref<8x384xf32, #tpu.memory_space<vmem>>, vector<8x384xf32>
    %c0_2 = arith.constant 0 : index
    %c0_3 = arith.constant 0 : index
    %4 = vector.load %arg3[%c0_2, %c0_3] : memref<8x1xi32, #tpu.memory_space<vmem>>, vector<8x1xi32>
    %c384_i32 = arith.constant 384 : i32
    %5 = arith.muli %arg1, %c384_i32 : i32
    %6 = tpu.iota {dimensions = array<i32: 1>} : vector<8x384xi32>
    %7 = vector.broadcast %5 : i32 to vector<8x384xi32>
    %8 = arith.addi %7, %6 : vector<8x384xi32>
    %cst = arith.constant dense<0xFF800000> : vector<8xf32>
    %9 = vector.multi_reduction <maximumf>, %3, %cst [1] : vector<8x384xf32> to vector<8xf32>
    %10 = vector.shape_cast %9 : vector<8xf32> to vector<8x1xf32>
    %c0_4 = arith.constant 0 : index
    %c0_5 = arith.constant 0 : index
    %11 = vector.load %arg5[%c0_4, %c0_5] : memref<8x1xf32, #tpu.memory_space<vmem>>, vector<8x1xf32>
    %12 = arith.maximumf %11, %10 : vector<8x1xf32>
    %13 = vector.broadcast %12 : vector<8x1xf32> to vector<8x384xf32>
    %14 = arith.subf %3, %13 : vector<8x384xf32>
    %15 = math.exp %14 : vector<8x384xf32>
    %c0_6 = arith.constant 0 : index
    %c0_7 = arith.constant 0 : index
    %16 = vector.load %arg6[%c0_6, %c0_7] : memref<8x1xf32, #tpu.memory_space<vmem>>, vector<8x1xf32>
    %c0_8 = arith.constant 0 : index
    %c0_9 = arith.constant 0 : index
    %17 = vector.load %arg5[%c0_8, %c0_9] : memref<8x1xf32, #tpu.memory_space<vmem>>, vector<8x1xf32>
    %18 = arith.subf %17, %12 : vector<8x1xf32>
    %19 = math.exp %18 : vector<8x1xf32>
    %20 = arith.mulf %16, %19 : vector<8x1xf32>
    %cst_10 = arith.constant dense<0.000000e+00> : vector<8xf32>
    %21 = vector.multi_reduction <add>, %15, %cst_10 [1] : vector<8x384xf32> to vector<8xf32>
    %22 = vector.shape_cast %21 : vector<8xf32> to vector<8x1xf32>
    %23 = arith.addf %20, %22 : vector<8x1xf32>
    %c0_11 = arith.constant 0 : index
    %c0_12 = arith.constant 0 : index
    %24 = vector.load %arg6[%c0_11, %c0_12] : memref<8x1xf32, #tpu.memory_space<vmem>>, vector<8x1xf32>
    tpu.vector_store %arg6[%c0_11, %c0_12], %23 {strides = array<i32>} : memref<8x1xf32, #tpu.memory_space<vmem>>, vector<8x1xf32>,
    %c0_13 = arith.constant 0 : index
    %c0_14 = arith.constant 0 : index
    %25 = vector.load %arg5[%c0_13, %c0_14] : memref<8x1xf32, #tpu.memory_space<vmem>>, vector<8x1xf32>
    tpu.vector_store %arg5[%c0_13, %c0_14], %12 {strides = array<i32>} : memref<8x1xf32, #tpu.memory_space<vmem>>, vector<8x1xf32>,
    %c0_15 = arith.constant 0 : index
    %c0_16 = arith.constant 0 : index
    %26 = vector.load %arg7[%c0_15, %c0_16] : memref<8x1xf32, #tpu.memory_space<vmem>>, vector<8x1xf32>
    %cst_17 = arith.constant dense<0.000000e+00> : vector<8xf32>
    %27 = vector.multi_reduction <add>, %3, %cst_17 [1] : vector<8x384xf32> to vector<8xf32>
    %28 = vector.shape_cast %27 : vector<8xf32> to vector<8x1xf32>
    %29 = arith.addf %26, %28 : vector<8x1xf32>
    %c0_18 = arith.constant 0 : index
    %c0_19 = arith.constant 0 : index
    %30 = vector.load %arg7[%c0_18, %c0_19] : memref<8x1xf32, #tpu.memory_space<vmem>>, vector<8x1xf32>
    tpu.vector_store %arg7[%c0_18, %c0_19], %29 {strides = array<i32>} : memref<8x1xf32, #tpu.memory_space<vmem>>, vector<8x1xf32>,
    %31 = vector.broadcast %4 : vector<8x1xi32> to vector<8x384xi32>
    %32 = arith.cmpi eq, %8, %31 : vector<8x384xi32>
    %cst_20 = arith.constant 0.000000e+00 : f32
    %33 = vector.broadcast %cst_20 : f32 to vector<8x384xf32>
    %34 = arith.select %32, %3, %33 : vector<8x384xi1>, vector<8x384xf32>
    %c0_21 = arith.constant 0 : index
    %c0_22 = arith.constant 0 : index
    %35 = vector.load %arg8[%c0_21, %c0_22] : memref<8x1xf32, #tpu.memory_space<vmem>>, vector<8x1xf32>
    %cst_23 = arith.constant dense<0.000000e+00> : vector<8xf32>
    %36 = vector.multi_reduction <add>, %34, %cst_23 [1] : vector<8x384xf32> to vector<8xf32>
    %37 = vector.shape_cast %36 : vector<8xf32> to vector<8x1xf32>
    %38 = arith.addf %35, %37 : vector<8x1xf32>
    %c0_24 = arith.constant 0 : index
    %c0_25 = arith.constant 0 : index
    %39 = vector.load %arg8[%c0_24, %c0_25] : memref<8x1xf32, #tpu.memory_space<vmem>>, vector<8x1xf32>
    tpu.vector_store %arg8[%c0_24, %c0_25], %38 {strides = array<i32>} : memref<8x1xf32, #tpu.memory_space<vmem>>, vector<8x1xf32>,
    %c0_i32_26 = arith.constant 0 : i32
    %40 = arith.cmpi eq, %arg1, %c0_i32_26 : i32
    %41 = arith.extui %40 : i1 to i32
    %c0_i32_27 = arith.constant 0 : i32
    %42 = arith.cmpi ne, %41, %c0_i32_27 : i32
    scf.if %42 {
      %c0_28 = arith.constant 0 : index
      %c0_29 = arith.constant 0 : index
      %43 = vector.load %arg5[%c0_28, %c0_29] : memref<8x1xf32, #tpu.memory_space<vmem>>, vector<8x1xf32>
      %c0_30 = arith.constant 0 : index
      %c0_31 = arith.constant 0 : index
      %44 = vector.load %arg6[%c0_30, %c0_31] : memref<8x1xf32, #tpu.memory_space<vmem>>, vector<8x1xf32>
      %45 = math.log %44 : vector<8x1xf32>
      %46 = arith.addf %43, %45 : vector<8x1xf32>
      %c0_32 = arith.constant 0 : index
      %c0_33 = arith.constant 0 : index
      %47 = vector.load %arg8[%c0_32, %c0_33] : memref<8x1xf32, #tpu.memory_space<vmem>>, vector<8x1xf32>
      %cst_34 = arith.constant 0.899999976 : f32
      %48 = vector.broadcast %cst_34 : f32 to vector<8x1xf32>
      %49 = arith.mulf %48, %47 : vector<8x1xf32>
      %50 = arith.subf %46, %49 : vector<8x1xf32>
      %c0_35 = arith.constant 0 : index
      %c0_36 = arith.constant 0 : index
      %51 = vector.load %arg7[%c0_35, %c0_36] : memref<8x1xf32, #tpu.memory_space<vmem>>, vector<8x1xf32>
      %cst_37 = arith.constant 2.6041668E-4 : f32
      %52 = vector.broadcast %cst_37 : f32 to vector<8x1xf32>
      %53 = arith.mulf %52, %51 : vector<8x1xf32>
      %54 = arith.subf %50, %53 : vector<8x1xf32>
      %c0_38 = arith.constant 0 : index
      %c0_39 = arith.constant 0 : index
      %55 = vector.load %arg4[%c0_38, %c0_39] : memref<8x1xf32, #tpu.memory_space<vmem>>, vector<8x1xf32>
      tpu.vector_store %arg4[%c0_38, %c0_39], %54 {strides = array<i32>} : memref<8x1xf32, #tpu.memory_space<vmem>>, vector<8x1xf32>,
    } else {
    }
    return
  }
  func.func @transform_0(%arg0: i32, %arg1: i32) -> (i32, i32) {
    %c0_i32 = arith.constant 0 : i32
    return %arg0, %arg1 : i32, i32
  }
  func.func @transform_1(%arg0: i32, %arg1: i32) -> (i32, i32) {
    %c0_i32 = arith.constant 0 : i32
    %c0_i32_0 = arith.constant 0 : i32
    return %arg0, %c0_i32 : i32, i32
  }
  func.func @transform_2(%arg0: i32, %arg1: i32) -> (i32, i32) {
    %c0_i32 = arith.constant 0 : i32
    %c0_i32_0 = arith.constant 0 : i32
    return %arg0, %c0_i32 : i32, i32
  }
}

</mosaic_0001>

<bundles_post_ra>
// kernel: tpu_custom_call.1
= control target key start
LH: loop header
LB: loop body
LE: loop exit
PB: predicated region body
PF: predicated region fallthrough
CT: control target
= control target key end

     0   :  { %7 = vsyncpa [#allocation7], 0  ;;  %s697_s0 = inlined_call_operand.hbm [shape: f32[12,384], index: 0, kind: input, shape index: {}]   ;;  %s698_s1 = inlined_call_operand.vmem [shape: s32[12,1], index: 1, kind: input, shape index: {}]   ;;  %s699_s2 = inlined_call_operand.vmem [shape: f32[12,1], index: 2, kind: output, shape index: {}]  }
   0x1   :  { %9 = vsyncpa [#allocation7 + $0x1], 0  ;;  %s559_s9 = smov 0   ;;  %s561_s10 = smov 0  }
   0x2   :  { %s563_s11 = smov 0   ;;  %s565_s12 = smov 0  }
   0x3   :  { %s567_s13 = smov 0   ;;  %s569_s14 = smov 0  }
   0x4 LB: > { %s375_s15 = sadd.s32 4294967295, %s538_s14   ;;  %s27_s16 = sadd.s32 1, %s534_s13  ;;  %s538_s14 = sphi %s569_s14, %s15_s14   ;;  %s534_s13 = sphi %s567_s13, %s708_s13   ;;  %s530_s12 = sphi %s565_s12, %s707_s12   ;;  %s526_s11 = sphi %s563_s11, %s706_s11   ;;  %s522_s10 = sphi %s561_s10, %s705_s10   ;;  %s518_s9 = sphi %s559_s9, %s704_s9  }
   0x5   : > { %p29_p0 = scmp.ge.s32.totalorder %s27_s16, 2  ;;  %s36_s17 = sadd.s32 1, %s526_s11 }
   0x6   : > { %p43_p1 = scmp.ne.s32.totalorder %s526_s11, %s522_s10  ;;  %p44_p2 = scmp.eq.s32.totalorder %s538_s14, 0 }
   0x7   : > { %s710_s16 = smov (%p29_p0, %s27_s16), 0  ;;  %p49_p4 = scmp.ne.s32.totalorder %s522_s10, %s518_s9 }
   0x8   : > { %p45_p3 = por %p44_p2, %p43_p1  ;;  %s31_s18 = ssub.s32 %s534_s13, %s710_s16 }
   0x9   : > { %p50_p5 = scmp.eq.s32.totalorder %s375_s15, 0  ;;  %p34_p6 = scmp.eq.s32.totalorder %s31_s18, 0 }
   0xa   : > { %p394_p8 = scmp.lt.s32.totalorder %s538_s14, 2  ;;  %s125_s21 = sand.u32 1, %s526_s11  }
   0xb   : > { %p598_p7 = por %p50_p5, %p49_p4  ;;  %s386_s22 = smul.u32 384, %s534_s13 }
   0xc   : > { %s604_s20 = scalar_select %p34_p6, %s526_s11, %s36_s17  }
   0xd   : > { %s385_s23 = smul.u32 24, %s125_s21  ;;  %s611_s26 = scalar_lea.hbm %s697_s0, %s386_s22 }
   0xe   : > { %p613_p9 = pnand %p394_p8, %p45_p3  ;;  %s126_s30 = scalar_lea.sflag [#allocation7], %s125_s21 }
   0xf   : > { %s129_s28 = scalar_lea.vmem [#allocation6], %s385_s23  ;;  %s458_s3 = scalar_lea.hbm %s611_s26, 384 }
  0x10   : > { %s139_s29 = sshll.u32 %s129_s28, 4  ;;  %p459_p12 = scmp.ne.s32.totalorder %s611_s26, %s458_s3  ;;  %s618_s29 = int_to_ptr.vmem [resolvable:$true] %s139_s29 }
  0x11   : > { %p460_p13 = pneg %p613_p9  ;;  %s463_s6 = scalar_lea.hbm %s697_s0, 768 }
  0x12   : > { %p464_p2 = scmp.lt.u32.totalorder %s611_s26, %s697_s0  ;;  %p465_p3 = scmp.lt.u32.totalorder %s463_s6, %s458_s3 }
  0x13   : > { %p461_p0 = pnand %p460_p13, %p459_p12  ;;  %p467_p5 = scmp.lt.u32.totalorder %s458_s3, %s611_s26 }
  0x14   : > { %p466_p4 = por %p465_p3, %p464_p2 }
  0x15   : > { %p462_p1 = pneg %p461_p0 }
  0x16   : > { %p468_p6 = por %p467_p5, %p466_p4 }
  0x18   : > { %p469_p8 = pnand %p468_p6, %p462_p1 }
  0x1a   : > { %472 = shalt.err (!%p469_p8)
}
  0x1b   : > { %s473_s9 = scalar_lea.vmem %s618_s29, 384  ;;  %s540_s15 = smov [#allocation6]  }
  0x1c   : > { %p474_p12 = scmp.ne.s32.totalorder %s618_s29, %s473_s9  ;;  %s478_s17 = sshll.u32 %s540_s15, 4  ;;  %s479_s17 = int_to_ptr.vmem [resolvable:$false] %s478_s17 }
  0x1d   : > { %s480_s18 = scalar_lea.vmem %s479_s17, 768  ;;  %p481_p11 = scmp.lt.s32.totalorder %s618_s29, %s479_s17 }
  0x1e   : > { %p476_p0 = pnand %p474_p12, %p460_p13  ;;  %p482_p2 = scmp.lt.s32.totalorder %s480_s18, %s473_s9 }
  0x20   : > { %p477_p10 = pneg %p476_p0  ;;  %p483_p3 = por %p482_p2, %p481_p11 }
  0x22   : > { %p484_p4 = pnand %p483_p3, %p477_p10 }
  0x24   : > { %487 = shalt.err (!%p484_p4)
}
  0x25   : > { %393 = dma.hbm_to_vmem [thread:$0]  (!%p613_p9), %s611_s26, 384, %s618_s29, %s126_s30  }
  0x26   : > { %p702_p1 = scmp.lt.s32.totalorder %s538_s14, 3  ;;  %p703_p5 = scmp.ge.s32.totalorder %s538_s14, 1 }
  0x28   : > { %p152_p13 = pnand %p703_p5, %p702_p1 }
  0x29   : > { %s157_s21 = sand.u32 (!%p152_p13), 1, %s522_s10  }
  0x2a   : > { %155 = sbr.rel (%p152_p13) target bundleno = 519 (0x207), region = 28  ;;  %s158_s23 = scalar_lea.sflag (!%p152_p13), [#allocation7], %s157_s21 }
  0x2b   : > { %s387_s22 = smul.u32 (!%p152_p13), 24, %s157_s21 }
  0x2d   : > { %s161_s24 = scalar_lea.vmem (!%p152_p13), [#allocation6], %s387_s22 }
  0x31   : > { %513 = dma.done.wait (%p598_p7), %s158_s23, 384  }
  0x32   : > { %515 = vsyncadd (%p598_p7), %s158_s23, 4294966912  ;;  %vm198_vm0 = vcmask 7168   ;;  %v541_v0 = vmov -inf   ;;  %v203_v1 = vld [vmem:[%s161_s24] sm:$0xff]  ;;  %v204_v2 = vld [vmem:[%s161_s24 + $0x8] sm:$0xff]  ;;  %v542_v6 = vmov 0   ;;  %v208_v13 = vlaneseq }
  0x33   : > { %199 = vst.msk [vmem:[#allocation2] sm:$0xff] %vm198_vm0, %v541_v0  ;;  %v205_v3 = vld [vmem:[%s161_s24 + $0x10] sm:$0xff]  ;;  %v216_v4 = vmax.f32 %v203_v1, %v204_v2  ;;  %446 = vset.pattern.permute.xlu0 %v542_v6  ;;  %447 = vset.pattern.permute.xlu1 %v542_v6  ;;  %p186_p9 = scmp.lt.s32.totalorder %s530_s12, 1  ;;  %v543_v7 = vmov 0.0   ;;  %v250_v35 = vadd.f32 %v204_v2, %v203_v1 }
  0x34   : > { %200 = vst.msk [vmem:[#allocation3] sm:$0xff] %vm198_vm0, %v543_v7  ;;  %201 = vst.msk [vmem:[#allocation4] sm:$0xff] %vm198_vm0, %v543_v7  ;;  %v209_v20 = vand.u32 127, %v208_v13 }
  0x35   : > { %v217_v5 = vmax.f32 %v216_v4, %v205_v3  ;;  %s712_s12 = smov (!%p186_p9, %s530_s12), 1  ;;  %202 = vst.msk [vmem:[#allocation5] sm:$0xff] %vm198_vm0, %v543_v7  ;;  %v251_v36 = vadd.f32 %v250_v35, %v205_v3 }
  0x36   : > { %s381_s19 = sshll.u32 %s712_s12, 3  ;;  %v210_v22 = vadd.s32 128, %v209_v20  ;;  %v211_v24 = vadd.s32 256, %v209_v20 }
  0x37   : > { %218 = vmax.xlane.f32.xlu0 %v217_v5  ;;  %s189_s27 = scalar_lea.vmem %s698_s1, %s381_s19  ;;  %s193_s30 = scalar_lea.vmem %s699_s2, %s381_s19 }
  0x38   : > { %v206_v8 = vld [vmem:[%s189_s27] sm:$0xff] }
  0x39   : > { %257 = vperm.xlu1 %447, %v206_v8  }
  0x3a   : > { %v220_v9 = vld [vmem:[#allocation2] sm:$0xff] }
  0x3b   : > { %v236_v39 = vld [vmem:[#allocation3] sm:$0xff]  ;;  %v249_v46 = vld [vmem:[#allocation4] sm:$0xff] }
  0x3c   : > { %v265_v43 = vld [vmem:[#allocation5] sm:$0xff] }
  0xb8   : > { %v258_v23 = vpop.permute.xlu1 %257 }
  0xb9   : > { %vm259_vm1 = vcmp.eq.s32.totalorder %v209_v20, %v258_v23  ;;  %vm260_vm2 = vcmp.eq.s32.totalorder %v210_v22, %v258_v23  ;;  %vm261_vm3 = vcmp.eq.s32.totalorder %v211_v24, %v258_v23 }
  0xba   : > { %v262_v25 = vsel %vm259_vm1, %v203_v1, 0.0  ;;  %v263_v26 = vsel %vm260_vm2, %v204_v2, 0.0  ;;  %v264_v32 = vsel %vm261_vm3, %v205_v3, 0.0 }
  0xbb   : > { %v266_v30 = vadd.f32 %v263_v26, %v262_v25 }
  0xbd   : > { %v267_v34 = vadd.f32 %v266_v30, %v264_v32 }
  0xc4   : > { %v219_v10 = vpop.xlane.xlu0 %218 }
  0xc5   : > { %v221_v11 = vmax.f32 %v220_v9, %v219_v10 }
  0xc7   : > { %v237_v12 = vsub.f32 %v220_v9, %v221_v11  ;;  %248 = vst.msk [vmem:[#allocation2] sm:$0xff] %vm198_vm0, %v221_v11  ;;  %224 = vperm.xlu0 %446, %v221_v11  }
  0xc9   : > { %v238_v37 = vmul.f32 1.442695, %v237_v12 }
  0xce   : > { %v275_v54 = vld [vmem:[#allocation2] sm:$0xff] }
 0x146   : > { %v225_v14 = vpop.permute.xlu0 %224 }
 0x147   : > { %v227_v15 = vsub.f32 %v203_v1, %v225_v14  ;;  %v228_v16 = vsub.f32 %v204_v2, %v225_v14  ;;  %v229_v17 = vsub.f32 %v205_v3, %v225_v14 }
 0x149   : > { %v230_v18 = vmul.f32 1.442695, %v227_v15  ;;  %v232_v19 = vmul.f32 1.442695, %v228_v16  ;;  %v234_v21 = vmul.f32 1.442695, %v229_v17 }
 0x14b   : > { %448 = vpow2.f32 %v230_v18 }
 0x14c   : > { %450 = vpow2.f32 %v232_v19 }
 0x14d   : > { %452 = vpow2.f32 %v234_v21 }
 0x14e   : > { %454 = vpow2.f32 %v238_v37 }
 0x155   : > { %v449_v27 = vpop.eup %448 }
 0x156   : > { %v451_v28 = vpop.eup %450 }
 0x157   : > { %v241_v29 = vadd.f32 %v451_v28, %v449_v27  ;;  %v453_v31 = vpop.eup %452 }
 0x158   : > { %v455_v38 = vpop.eup %454 }
 0x159   : > { %v242_v33 = vadd.f32 %v453_v31, %v241_v29  ;;  %v240_v40 = vmul.f32 %v455_v38, %v236_v39 }
 0x15b   : > { %243 = vadd.xlane.f32.xlu1 %v242_v33 }
 0x15f   : > { %268 = vadd.xlane.f32.xlu1 %v267_v34 }
 0x163   : > { %252 = vadd.xlane.f32.xlu1 %v251_v36 }
 0x1e8   : > { %v244_v41 = vpop.xlane.xlu1 %243 }
 0x1e9   : > { %v245_v42 = vadd.f32 %v244_v41, %v240_v40 }
 0x1eb   : > { %247 = vst.msk [vmem:[#allocation3] sm:$0xff] %vm198_vm0, %v245_v42 }
 0x1ec   : > { %v269_v44 = vpop.xlane.xlu1 %268 }
 0x1ed   : > { %v270_v45 = vadd.f32 %v269_v44, %v265_v43 }
 0x1ef   : > { %271 = vst.msk [vmem:[#allocation5] sm:$0xff] %vm198_vm0, %v270_v45 }
 0x1f0   : > { %v253_v47 = vpop.xlane.xlu1 %252 }
 0x1f1   : > { %v254_v48 = vadd.f32 %v253_v47, %v249_v46 }
 0x1f2   : > { %v276_v49 = vld [vmem:[#allocation3] sm:$0xff] }
 0x1f3   : > { %456 = vlog2.f32 %v276_v49  ;;  %255 = vst.msk [vmem:[#allocation4] sm:$0xff] %vm198_vm0, %v254_v48 }
 0x1f6   : > { %v280_v51 = vld [vmem:[#allocation5] sm:$0xff] }
 0x1f7   : > { %v281_v56 = vmul.f32 0.9, %v280_v51 }
 0x1fa   : > { %v283_v52 = vld [vmem:[#allocation4] sm:$0xff] }
 0x1fb   : > { %v284_v57 = vmul.f32 0.00026041668, %v283_v52 }
 0x1fd   : > { %v457_v50 = vpop.eup %456 }
 0x1fe   : > { %v278_v53 = vmul.f32 0.6931472, %v457_v50 }
 0x200   : > { %v279_v55 = vadd.f32 %v278_v53, %v275_v54 }
 0x202   : > { %v282_v58 = vsub.f32 %v279_v55, %v281_v56 }
 0x204   : > { %v285_v59 = vsub.f32 %v282_v58, %v284_v57 }
 0x206   : > { %286 = vst.msk [vmem:[%s193_s30] sm:$0xff] %vm198_vm0, %v285_v59 }
 0x207 PF: > { %s15_s14 = sadd.s32 1, %s538_s14   ;;  %s704_s9 = smov %s522_s10 }
 0x208   : > { %p12_p7 = scmp.ge.s32.totalorder %s15_s14, 4   ;;  %s705_s10 = smov %s526_s11 }
 0x209   : > { %s706_s11 = smov %s604_s20  ;;  %s707_s12 = smov %s534_s13 }
 0x20a   : > { %s708_s13 = smov %s710_s16  ;;  %14 = sbr.rel (!%p12_p7) target bundleno = 4 (0x4), region = 79 }
 0x211   :  { %306 = vsyncpa [#allocation7], 1 }
 0x212   :  { %308 = vsyncpa [#allocation7 + $0x1], 1 }

</bundles_post_ra>
